<compile_context>
chip_gen: v5e
topology: v5e:2x2
jax: 0.10.0
libtpu: 0.0.40
codegen_flags: <defaults>
</compile_context>

<pallas_src>
import functools
from math import sqrt

import jax
import jax.numpy as jnp
from jax.experimental import pallas as pl
from jax.experimental.pallas import tpu as pltpu

HIGH = jax.lax.Precision.HIGHEST  # reference path only


# ---------------------------------------------------------------------------
# Kernel 1: fused Q/K/V projections.
#   y[p] = x[p] @ w[p] + b[p]   for p in {q, k, v}, one pallas_call, row-tiled.
# ---------------------------------------------------------------------------
def _proj_kernel(x_ref, w_ref, b_ref, o_ref):
    acc = jnp.dot(x_ref[0], w_ref[0], preferred_element_type=jnp.float32)
    o_ref[0] = (acc + b_ref[0]).astype(o_ref.dtype)


def _pick_row_tile(n):
    # Largest row tile (multiple of 16 for bf16 sublane packing) dividing n.
    for tm in (1024, 512, 256, 128, 64, 32, 16):
        if n % tm == 0:
            return tm
    return n  # full extent is always a legal block


def fused_qkv_projection(x_st, w_st, b_st):
    """x_st: (3, N, d_in) bf16, w_st: (3, d_in, d_out) bf16, b_st: (3, 1, d_out) f32."""
    P, N, d_in = x_st.shape
    d_out = w_st.shape[-1]
    tm = _pick_row_tile(N)
    # TODO(synk): for very large d_model, tile the (d_in, d_out) weight block
    # (it is double-buffered) so two copies still fit v7x's 64 MiB VMEM.
    return pl.pallas_call(
        _proj_kernel,
        out_shape=jax.ShapeDtypeStruct((P, N, d_out), jnp.bfloat16),
        grid=(P, N // tm),
        in_specs=[
            pl.BlockSpec((1, tm, d_in), lambda p, i: (p, i, 0)),
            pl.BlockSpec((1, d_in, d_out), lambda p, i: (p, 0, 0)),
            pl.BlockSpec((1, 1, d_out), lambda p, i: (p, 0, 0)),
        ],
        out_specs=pl.BlockSpec((1, tm, d_out), lambda p, i: (p, i, 0)),
        compiler_params=pltpu.CompilerParams(
            dimension_semantics=("parallel", "parallel"),
            vmem_limit_bytes=64 * 1024 * 1024),
    )(x_st, w_st, b_st)


# ---------------------------------------------------------------------------
# Kernel 2: fused relative attention + output projection on a (batch, head)
# grid; heads accumulate into an f32 VMEM scratch (output projection folded).
# ---------------------------------------------------------------------------
def _rel_attn_kernel(*refs, scale, has_mask):
    if has_mask:
        (q_ref, k_ref, v_ref, e_ref, wo_ref, bo_ref, bias_ref,
         o_ref, acc_ref) = refs
    else:
        q_ref, k_ref, v_ref, e_ref, wo_ref, bo_ref, o_ref, acc_ref = refs
        bias_ref = None

    h = pl.program_id(1)
    L = q_ref.shape[2]

    @pl.when(h == 0)
    def _():
        acc_ref[...] = jnp.zeros_like(acc_ref)

    qh = q_ref[0, 0] * scale       # (L, depth) bf16; 1/sqrt(depth) folded here
    kh = k_ref[0, 0]               # (L, depth) bf16
    vh = v_ref[0, 0]               # (L, depth) bf16
    eh = e_ref[0]                  # (L, depth) bf16

    # One MXU issue per head for both Q@K^T and Q@E^T.
    ke = jnp.concatenate([kh, eh], axis=0)                            # (2L, depth)
    dims = (((1,), (1,)), ((), ()))
    scores = jax.lax.dot_general(qh, ke, dims,
                                 preferred_element_type=jnp.float32)  # (L, 2L)
    qkt = scores[:, :L]
    r1 = scores[:, L:]

    # Exact torch skew():
    #   srel[i, j] = r1[i, L-1-i+j]   j <= i      (sheared lower triangle)
    #              = 0                j == i+1
    #              = r1[i+1, j-i-2]   j >= i+2    (wrapped upper triangle)
    # One strided lane roll (row i rolled by i+1) gives the shear; a one-row
    # sublane roll of that result supplies the wrapped values.
    srel_low = pltpu.roll(r1, shift=1, axis=1, stride=1, stride_axis=0)
    srel_up = pltpu.roll(srel_low, shift=L - 1, axis=0)
    row = jax.lax.broadcasted_iota(jnp.int32, (L, L), 0)
    col = jax.lax.broadcasted_iota(jnp.int32, (L, L), 1)
    srel = jnp.where(col <= row, srel_low,
                     jnp.where(col == row + 1, 0.0, srel_up))

    logits = qkt + srel
    if has_mask:
        logits = logits + bias_ref[...]

    m = jnp.max(logits, axis=-1, keepdims=True)
    p = jnp.exp(logits - m)
    denom = jnp.sum(p, axis=-1, keepdims=True)
    probs = (p * pl.reciprocal(denom, approx=True)).astype(jnp.bfloat16)

    attn_h = jnp.dot(probs, vh, preferred_element_type=jnp.float32)   # (L, depth)
    # Fold the output projection: concat_h(attn_h) @ Wo == sum_h attn_h @ Wo_h.
    acc_ref[...] += jnp.dot(attn_h.astype(jnp.bfloat16), wo_ref[0],
                            preferred_element_type=jnp.float32)

    @pl.when(h == pl.num_programs(1) - 1)
    def _():
        o_ref[0] = (acc_ref[...] + bo_ref[...]).astype(o_ref.dtype)


def fused_rel_attention(Qh, Kh, Vh, Eh, Wo_h, bo, bias, *, depth):
    B, H, L, _ = Qh.shape
    d_model = Wo_h.shape[-1]
    has_mask = bias is not None
    kern = functools.partial(_rel_attn_kernel,
                             scale=1.0 / sqrt(depth), has_mask=has_mask)

    in_specs = [
        pl.BlockSpec((1, 1, L, depth), lambda b, h: (b, h, 0, 0)),   # Q
        pl.BlockSpec((1, 1, L, depth), lambda b, h: (b, h, 0, 0)),   # K
        pl.BlockSpec((1, 1, L, depth), lambda b, h: (b, h, 0, 0)),   # V
        pl.BlockSpec((1, L, depth), lambda b, h: (h, 0, 0)),         # E per head
        pl.BlockSpec((1, depth, d_model), lambda b, h: (h, 0, 0)),   # Wo row slice
        pl.BlockSpec((1, d_model), lambda b, h: (0, 0)),             # bo
    ]
    args = [Qh, Kh, Vh, Eh, Wo_h, bo]
    if has_mask:
        in_specs.append(pl.BlockSpec((L, L), lambda b, h: (0, 0)))   # shared bias
        args.append(bias)

    # TODO(synk): for long sequences add an Lq-tile grid axis (parallel; feeds
    # v7x's second TensorCore) and flash-style Lk tiling; the strided-roll
    # shear then takes the global row offset as a dynamic shift.
    return pl.pallas_call(
        kern,
        out_shape=jax.ShapeDtypeStruct((B, L, d_model), jnp.bfloat16),
        grid=(B, H),
        in_specs=in_specs,
        out_specs=pl.BlockSpec((1, L, d_model), lambda b, h: (b, 0, 0)),
        scratch_shapes=[pltpu.VMEM((L, d_model), jnp.float32)],
        compiler_params=pltpu.CompilerParams(
            dimension_semantics=("parallel", "arbitrary"),
            vmem_limit_bytes=64 * 1024 * 1024),
    )(*args)


# ------------------------------ JAX glue -----------------------------------
def skew(t):
    """Exact JAX mirror of the torch skew (pad -> reshape -> slice). Reference only."""
    Lq, Lk = t.shape[-2], t.shape[-1]
    padded = jnp.pad(t, [(0, 0)] * (t.ndim - 1) + [(1, 0)])
    srel = padded.reshape(-1, Lk + 1, Lq)[:, 1:]
    return srel.reshape(t.shape)


def split_heads(x, num_heads, depth):
    x = x.reshape(*x.shape[:-1], num_heads, depth)
    return jnp.swapaxes(x, -2, -3)


def get_required_embeddings(E, seq_len, max_len):
    first = E[0:1]
    n_repeat = max(seq_len - max_len, 0)
    parts = [first] * n_repeat + [E[max(max_len - seq_len, 0):max_len]]
    return jnp.concatenate(parts, axis=0)


def init_params(key, d_model, num_heads, max_rel_dist):
    ks = jax.random.split(key, 9)
    bound = 1.0 / sqrt(d_model)

    def lin(kw, kb):
        w = jax.random.uniform(kw, (d_model, d_model), jnp.float32, -bound, bound)
        b = jax.random.uniform(kb, (d_model,), jnp.float32, -bound, bound)
        return w, b

    wq_w, wq_b = lin(ks[0], ks[1])
    wk_w, wk_b = lin(ks[2], ks[3])
    wv_w, wv_b = lin(ks[4], ks[5])
    wo_w, wo_b = lin(ks[6], ks[7])
    E = jax.random.normal(ks[8], (max_rel_dist, d_model), jnp.float32)
    return dict(num_heads=num_heads,
                wq_w=wq_w, wq_b=wq_b, wk_w=wk_w, wk_b=wk_b,
                wv_w=wv_w, wv_b=wv_b, wo_w=wo_w, wo_b=wo_b, E=E)


def mha_forward(params, q, k, v, mask=None):
    d_model = params["wq_w"].shape[0]
    H = params["num_heads"]
    depth = d_model // H
    max_rel = params["E"].shape[0]

    lead = q.shape[:-2]
    Lq, Lk = q.shape[-2], k.shape[-2]
    if Lq != Lk or q.shape != k.shape or k.shape != v.shape:
        # TODO(synk): cross-attention (Lq != Lk) needs the general flat-skew index map.
        raise ValueError("fused kernel expects q, k, v of identical (..., L, d) shape")
    if d_model % 128 != 0 or Lq % 128 != 0:
        # TODO(synk): pad d_model / L to multiples of 128 instead of raising; the
        # strided-roll skew and lane-dense stores assume 128-aligned tiles.
        raise ValueError("fused kernel requires d_model and L to be multiples of 128")

    B = 1
    for s in lead:
        B *= s

    # ---- one fused Pallas kernel for all three input projections -----------
    x_st = jnp.stack([q.reshape(-1, d_model),
                      k.reshape(-1, d_model),
                      v.reshape(-1, d_model)]).astype(jnp.bfloat16)      # (3, N, d)
    w_st = jnp.stack([params["wq_w"], params["wk_w"],
                      params["wv_w"]]).astype(jnp.bfloat16)              # (3, d, d)
    b_st = jnp.stack([params["wq_b"], params["wk_b"],
                      params["wv_b"]])[:, None, :]                       # (3, 1, d) f32
    qkv = fused_qkv_projection(x_st, w_st, b_st)                         # (3, N, d) bf16

    Qh = split_heads(qkv[0].reshape(B, Lq, d_model), H, depth)           # (B,H,L,dep)
    Kh = split_heads(qkv[1].reshape(B, Lk, d_model), H, depth)
    Vh = split_heads(qkv[2].reshape(B, Lk, d_model), H, depth)

    emb = get_required_embeddings(params["E"], Lk, max_rel)
    Eh = split_heads(emb.astype(jnp.bfloat16), H, depth)                 # (H, L, dep)
    Wo_h = params["wo_w"].astype(jnp.bfloat16).reshape(H, depth, d_model)
    bo = params["wo_b"].reshape(1, d_model)

    if mask is not None:
        m2 = jnp.asarray(mask, jnp.float32)
        if m2.ndim > 2:
            # TODO(synk): per-(batch, head) masks would need a batch/head-indexed mask spec.
            m2 = m2[(0,) * (m2.ndim - 2)]
        bias = jnp.broadcast_to(m2, (Lq, Lk)) * (-1e9)
    else:
        bias = None

    out = fused_rel_attention(Qh, Kh, Vh, Eh, Wo_h, bo, bias, depth=depth)
    return out.reshape(*lead, Lq, d_model)   # bf16 (f32-accumulated internally)


# --------------------------- pure-JAX reference -----------------------------
def ref_forward(params, q, k, v, mask=None):
    d_model = params["wq_w"].shape[0]
    H = params["num_heads"]
    depth = d_model // H
    max_rel = params["E"].shape[0]

    Q = jnp.matmul(q, params["wq_w"], precision=HIGH) + params["wq_b"]
    K = jnp.matmul(k, params["wk_w"], precision=HIGH) + params["wk_b"]
    V = jnp.matmul(v, params["wv_w"], precision=HIGH) + params["wv_b"]

    Lk = k.shape[-2]
    e = get_required_embeddings(params["E"], Lk, max_rel)

    Qh = split_heads(Q, H, depth)
    Kh = split_heads(K, H, depth)
    Vh = split_heads(V, H, depth)
    eh = split_heads(e, H, depth)

    QKt = jnp.matmul(Qh, jnp.swapaxes(Kh, -1, -2), precision=HIGH)
    Srel = skew(jnp.matmul(Qh, jnp.swapaxes(eh, -1, -2), precision=HIGH))
    logits = (QKt + Srel) / sqrt(depth)
    if mask is not None:
        logits = logits + mask * (-1e9)
    probs = jax.nn.softmax(logits, axis=-1)
    attn = jnp.matmul(probs, Vh, precision=HIGH)
    attn = jnp.swapaxes(attn, -2, -3)
    attn = attn.reshape(*attn.shape[:-2], d_model)
    return jnp.matmul(attn, params["wo_w"], precision=HIGH) + params["wo_b"]


# ---------------------------------- main ------------------------------------
if __name__ == "__main__":
    # Lane-dense shapes (d_model and L multiples of 128) per the perf review;
    # max_rel_dist < L exercises the embedding-repeat path of the module.
    d_model, num_heads, max_rel_dist = 128, 4, 10
    B, L = 2, 128

    key = jax.random.PRNGKey(0)
    kp, kq, kk, kv = jax.random.split(key, 4)
    params = init_params(kp, d_model, num_heads, max_rel_dist)

    q = jax.random.normal(kq, (B, L, d_model), jnp.float32)
    k = jax.random.normal(kk, (B, L, d_model), jnp.float32)
    v = jax.random.normal(kv, (B, L, d_model), jnp.float32)

    # mask=None path (exercises the exact skew incl. wrapped upper triangle)
    out = jax.block_until_ready(mha_forward(params, q, k, v, mask=None))
    ref = ref_forward(params, q, k, v, mask=None)
    assert out.shape == (B, L, d_model)
    assert jnp.allclose(out.astype(jnp.float32), ref, atol=5e-2, rtol=5e-2), float(
        jnp.max(jnp.abs(out.astype(jnp.float32) - ref)))

    # causal-mask path (ones mark positions to mask)
    causal = jnp.triu(jnp.ones((L, L), jnp.float32), k=1)
    out_m = jax.block_until_ready(mha_forward(params, q, k, v, mask=causal))
    ref_m = ref_forward(params, q, k, v, mask=causal)
    assert jnp.allclose(out_m.astype(jnp.float32), ref_m, atol=5e-2, rtol=5e-2), float(
        jnp.max(jnp.abs(out_m.astype(jnp.float32) - ref_m)))

    print("KERNEL_OK")
</pallas_src>

<mosaic_0001>
module attributes {stable_mosaic.version = 11 : i64} {
  func.func @_proj_kernel(%arg0: i32, %arg1: i32, %arg2: memref<1x256x128xbf16, #tpu.memory_space<vmem>>, %arg3: memref<1x128x128xbf16, #tpu.memory_space<vmem>>, %arg4: memref<1x1x128xf32, #tpu.memory_space<vmem>>, %arg5: memref<1x256x128xbf16, #tpu.memory_space<vmem>>) attributes {dimension_semantics = [#tpu.dimension_semantics<parallel>, #tpu.dimension_semantics<parallel>], iteration_bounds = array<i64: 3, 1>, scalar_prefetch = 0 : i64, scratch_operands = 0 : i64, tpu.core_type = #tpu.core_type<tc>, window_params = [{transform_indices = @transform_0, window_bounds = array<i64: 1, 256, 128>}, {transform_indices = @transform_1, window_bounds = array<i64: 1, 128, 128>}, {transform_indices = @transform_2, window_bounds = array<i64: 1, 1, 128>}, {transform_indices = @transform_3, window_bounds = array<i64: 1, 256, 128>}]} {
    %c0 = arith.constant 0 : index
    %c0_0 = arith.constant 0 : index
    %c0_1 = arith.constant 0 : index
    %0 = vector.load %arg2[%c0, %c0_0, %c0_1] : memref<1x256x128xbf16, #tpu.memory_space<vmem>>, vector<1x256x128xbf16>
    %1 = vector.shape_cast %0 : vector<1x256x128xbf16> to vector<256x128xbf16>
    %c0_2 = arith.constant 0 : index
    %c0_3 = arith.constant 0 : index
    %c0_4 = arith.constant 0 : index
    %2 = vector.load %arg3[%c0_2, %c0_3, %c0_4] : memref<1x128x128xbf16, #tpu.memory_space<vmem>>, vector<1x128x128xbf16>
    %3 = vector.shape_cast %2 : vector<1x128x128xbf16> to vector<128x128xbf16>
    %cst = arith.constant dense<0.000000e+00> : vector<256x128xf32>
    %4 = tpu.matmul %1, %3, %cst {dimension_numbers = #tpu.dot_dimension_numbers<[1], [0], [0], [1], [0, 0, 1, 1], [], []>} : vector<256x128xbf16>, vector<128x128xbf16>, vector<256x128xf32> -> vector<256x128xf32>
    %c0_5 = arith.constant 0 : index
    %c0_6 = arith.constant 0 : index
    %c0_7 = arith.constant 0 : index
    %5 = vector.load %arg4[%c0_5, %c0_6, %c0_7] : memref<1x1x128xf32, #tpu.memory_space<vmem>>, vector<1x1x128xf32>
    %6 = vector.shape_cast %5 : vector<1x1x128xf32> to vector<1x128xf32>
    %7 = vector.broadcast %6 : vector<1x128xf32> to vector<256x128xf32>
    %8 = arith.addf %4, %7 : vector<256x128xf32>
    %9 = arith.truncf %8 : vector<256x128xf32> to vector<256x128xbf16>
    %c0_8 = arith.constant 0 : index
    %c0_9 = arith.constant 0 : index
    %c0_10 = arith.constant 0 : index
    %10 = vector.load %arg5[%c0_8, %c0_9, %c0_10] : memref<1x256x128xbf16, #tpu.memory_space<vmem>>, vector<1x256x128xbf16>
    %11 = vector.shape_cast %10 : vector<1x256x128xbf16> to vector<256x128xbf16>
    %12 = vector.shape_cast %9 : vector<256x128xbf16> to vector<1x256x128xbf16>
    tpu.vector_store %arg5[%c0_8, %c0_9, %c0_10], %12 {strides = array<i32>} : memref<1x256x128xbf16, #tpu.memory_space<vmem>>, vector<1x256x128xbf16>,
    return
  }
  func.func @transform_0(%arg0: i32, %arg1: i32) -> (i32, i32, i32) {
    %c0_i32 = arith.constant 0 : i32
    %c0_i32_0 = arith.constant 0 : i32
    return %arg0, %arg1, %c0_i32 : i32, i32, i32
  }
  func.func @transform_1(%arg0: i32, %arg1: i32) -> (i32, i32, i32) {
    %c0_i32 = arith.constant 0 : i32
    %c0_i32_0 = arith.constant 0 : i32
    %c0_i32_1 = arith.constant 0 : i32
    return %arg0, %c0_i32, %c0_i32_0 : i32, i32, i32
  }
  func.func @transform_2(%arg0: i32, %arg1: i32) -> (i32, i32, i32) {
    %c0_i32 = arith.constant 0 : i32
    %c0_i32_0 = arith.constant 0 : i32
    %c0_i32_1 = arith.constant 0 : i32
    return %arg0, %c0_i32, %c0_i32_0 : i32, i32, i32
  }
  func.func @transform_3(%arg0: i32, %arg1: i32) -> (i32, i32, i32) {
    %c0_i32 = arith.constant 0 : i32
    %c0_i32_0 = arith.constant 0 : i32
    return %arg0, %arg1, %c0_i32 : i32, i32, i32
  }
}

</mosaic_0001>

<bundles_post_ra>
// kernel: tpu_custom_call.1
= control target key start
LH: loop header
LB: loop body
LE: loop exit
PB: predicated region body
PF: predicated region fallthrough
CT: control target
= control target key end

     0   :  { %s1559_s0 = inlined_call_operand.hbm [shape: bf16[3,256,128], index: 0, kind: input, shape index: {}]   ;;  %s1560_s1 = inlined_call_operand.hbm [shape: bf16[3,128,128], index: 1, kind: input, shape index: {}]   ;;  %s1561_s2 = inlined_call_operand.hbm [shape: f32[3,1,128], index: 2, kind: input, shape index: {}]   ;;  %s1562_s3 = inlined_call_operand.hbm [shape: bf16[3,256,128], index: 3, kind: output, shape index: {}]  }
   0x1   :  { %1567 = sst [smem:[#allocation17_spill]] %s1560_s1 }
   0x2   :  { %8 = vsyncpa [#allocation3], 0 }
   0x3   :  { %10 = vsyncpa [#allocation3 + $0x1], 0 }
   0x4   :  { %11 = vsyncpa [#allocation6], 0 }
   0x5   :  { %13 = vsyncpa [#allocation6 + $0x1], 0 }
   0x6   :  { %14 = vsyncpa [#allocation4], 0 }
   0x7   :  { %16 = vsyncpa [#allocation4 + $0x1], 0  ;;  %s1318_s12 = smov 0   ;;  %s1320_s13 = smov 0  }
   0x8   :  { %s1322_s14 = smov 0   ;;  %s1324_s15 = smov 0  }
   0x9   :  { %s1326_s16 = smov 0   ;;  %s1328_s17 = smov 0  }
   0xa LB: > { %1568 = sst [smem:[#allocation12_spill]] %s1272_s12  ;;  %s1349_s18 = sadd.s32 4294967295, %s1292_s17   ;;  %s1292_s17 = sphi %s1328_s17, %s22_s17   ;;  %s1288_s16 = sphi %s1326_s16, %s1587_s16   ;;  %s1284_s15 = sphi %s1324_s15, %s1586_s15   ;;  %s1280_s14 = sphi %s1322_s14, %s1582_s14   ;;  %s1276_s13 = sphi %s1320_s13, %s1585_s13   ;;  %s1272_s12 = sphi %s1318_s12, %s1584_s12  }
   0xb   : > { %1569 = sst [smem:[#allocation13_spill]] %s1280_s14  ;;  %s779_s19 = sadd.s32 4294967294, %s1292_s17  }
   0xc   : > { %s34_s20 = sadd.s32 1, %s1288_s16  ;;  %s43_s21 = sadd.s32 1, %s1280_s14 }
   0xd   : > { %p36_p0 = scmp.ge.s32.totalorder %s34_s20, 3  ;;  %p50_p1 = scmp.ne.s32.totalorder %s1280_s14, %s1276_s13 }
   0xe   : > { %p51_p2 = scmp.eq.s32.totalorder %s1292_s17, 0  ;;  %p56_p3 = scmp.ne.s32.totalorder %s1276_s13, %s1272_s12 }
   0xf   : > { %s1589_s20 = smov (%p36_p0, %s34_s20), 0  ;;  %p57_p5 = scmp.eq.s32.totalorder %s1349_s18, 0 }
  0x10   : > { %1570 = sst [smem:[#allocation14_spill]] %s1589_s20  ;;  %p52_p4 = por %p51_p2, %p50_p1 }
  0x11   : > { %s38_s22 = ssub.s32 %s1288_s16, %s1589_s20  ;;  %p134_p6 = scmp.eq.s32.totalorder %s1349_s18, 2 }
  0x12   : > { %p41_p7 = scmp.eq.s32.totalorder %s38_s22, 0  ;;  %p1365_p8 = por %p57_p5, %p56_p3 }
  0x13   : > { %p1369_p9 = por %p134_p6, %p50_p1  ;;  %p140_p10 = scmp.eq.s32.totalorder %s779_s19, 2 }
  0x14   : > { %s1374_s25 = scalar_select %p41_p7, %s1280_s14, %s43_s21  }
  0x15   : > { %p1376_p11 = por %p140_p10, %p56_p3  ;;  %p1061_p12 = scmp.lt.s32.totalorder %s1292_s17, 3 }
  0x16   : > { %1573 = sst [smem:[#allocation15_spill]] %s1374_s25  ;;  %s1382_s27 = sand.u32 1, %s1280_s14  }
  0x17   : > { %s1574_s26 = scalar_select %p1376_p11, 1, 0 }
  0x18   : > { %p1384_p13 = pnand %p1061_p12, %p52_p4  ;;  %s184_s29 = sand.u32 1, %s1292_s17  }
  0x19   : > { %1575 = sst [smem:[#allocation16_spill]] %s1574_s26  ;;  %s785_s30 = sshll.u32 %s1382_s27, 6 }
  0x1a   : > { %s894_s4 = sshll.u32 %s1288_s16, 6  ;;  %s188_s5 = scalar_lea.vmem [#allocation5], %s785_s30 }
  0x1b   : > { %s196_s6 = sshll.u32 %s188_s5, 4  ;;  %s1577_s1 = sld [smem:[#allocation17_spill]]  ;;  %s197_s6 = int_to_ptr.vmem [resolvable:$true] %s196_s6 }
  0x1c   : > { %p788_p0 = scmp.ge.s32.totalorder %s1292_s17, 1  ;;  %p221_p1 = scmp.lt.s32.totalorder %s1292_s17, 4 }
  0x1d   : > { %s185_s11 = scalar_lea.sflag [#allocation6], %s184_s29  ;;  %s1294_s19 = smov 64  }
  0x1e   : > { %s1295_s21 = smov 4   ;;  %p1398_p2 = pnand %p788_p0, %p221_p1 }
  0x1f   : > { %s782_s30 = sshll.u32 %s1382_s27, 7  ;;  %s161_s29 = scalar_lea.sflag [#allocation3], %s1382_s27 }
  0x20   : > { %s212_s25 = scalar_lea.hbm %s1561_s2, %s1288_s16  ;;  %s209_s26 = scalar_lea.vmem [#allocation7], %s1382_s27 }
  0x21   : > { %s193_s9 = scalar_lea.hbm %s1577_s1, %s894_s4  ;;  %s893_s4 = sshll.u32 %s1288_s16, 7 }
  0x22   : > { %s194_s10 = sshll.u32 %s193_s9, 4  ;;  %s171_s8 = scalar_lea.hbm %s1559_s0, %s893_s4  ;;  %s195_s10 = int_to_ptr.hbm [resolvable:$true] %s194_s10 }
  0x23   : > { %1053 = dma.hbm_to_vmem [thread:$0]  (!%p1384_p13), %s195_s10, 1024, %s197_s6, %s185_s11, %s1294_s19, %s1294_s19, %s1295_s21  }
  0x24   : > { %s172_s9 = sshll.u32 %s171_s8, 4  ;;  %s164_s1 = scalar_lea.vmem [#allocation2], %s782_s30  ;;  %s173_s9 = int_to_ptr.hbm [resolvable:$true] %s172_s9 }
  0x25   : > { %s174_s20 = sshll.u32 %s164_s1, 4  ;;  %s214_s14 = sshll.u32 %s212_s25, 4  ;;  %s175_s20 = int_to_ptr.vmem [resolvable:$true] %s174_s20  ;;  %s215_s14 = int_to_ptr.hbm [resolvable:$true] %s214_s14 }
  0x26   : > { %1050 = dma.hbm_to_vmem [thread:$0]  (!%p1384_p13), %s173_s9, 2048, %s175_s20, %s161_s29, %s1294_s19, %s1294_s19, %s1295_s21  }
  0x27   : > { %s216_s12 = sshll.u32 %s209_s26, 4  ;;  %225 = sbr.rel (%p1398_p2) target bundleno = 278 (0x116), region = 32  ;;  %s217_s12 = int_to_ptr.vmem [resolvable:$true] %s216_s12 }
  0x28   : > { %1056 = dma.hbm_to_vmem [thread:$0]  (!%p1384_p13), %s215_s14, 16, %s217_s12, %s185_s11  }
  0x29   : > { %s1420_s1 = sand.u32 (!%p1398_p2), 1, %s1276_s13  }
  0x2a   : > { %s789_s20 = sshll.u32 (!%p1398_p2), %s1420_s1, 7  ;;  %s228_s19 = scalar_lea.sflag (!%p1398_p2), [#allocation3], %s1420_s1 }
  0x2b   : > { %s1426_s25 = scalar_lea.vmem (!%p1398_p2), [#allocation2], %s789_s20 }
  0x2c   : > { %1259 = dma.done.wait (%p1365_p8), %s228_s19, 2048  }
  0x2d   : > { %1261 = vsyncadd (%p1365_p8), %s228_s19, 4294965248  ;;  %s237_s12 = sand.u32 1, %s1349_s18   ;;  %s790_s14 = sshll.u32 %s1420_s1, 6 }
  0x2e   : > { %s238_s26 = scalar_lea.sflag [#allocation6], %s237_s12  ;;  %s1434_s27 = scalar_lea.vmem [#allocation5], %s790_s14 }
  0x2f   : > { %1263 = dma.done.wait (%p1365_p8), %s238_s26, 1040  }
  0x30   : > { %1265 = vsyncadd (%p1365_p8), %s238_s26, 4294966256  ;;  %v918_v0 = vld [vmem:[%s1434_s27 + $0x38] sm:$0xff]  ;;  %v917_v1 = vld [vmem:[%s1434_s27 + $0x30] sm:$0xff]  ;;  %s250_s18 = scalar_lea.vmem [#allocation7], %s1420_s1  ;;  %s1475_s23 = scalar_lea.vmem [#allocation8], %s789_s20 }
  0x31   : > { %481 = vmatpush.bf16.msra.mxu0 %v918_v0  ;;  %1015 = vmatpush.bf16.msra.mxu1 %v918_v0  ;;  %v916_v2 = vld [vmem:[%s1434_s27 + $0x28] sm:$0xff]  ;;  %v915_v3 = vld [vmem:[%s1434_s27 + $0x20] sm:$0xff]  ;;  %v914_v4 = vld [vmem:[%s1434_s27 + $0x18] sm:$0xff]  ;;  %s919_s28 = sshll.u32 %s1284_s15, 7  ;;  %s649_s30 = sshll.u32 %s1475_s23, 4  ;;  %s650_s30 = int_to_ptr.vmem [resolvable:$true] %s649_s30 }
  0x32   : > { %1016 = vmatpush.bf16.msra.mxu2 %v918_v0  ;;  %1017 = vmatpush.bf16.msra.mxu3 %v918_v0  ;;  %v913_v5 = vld [vmem:[%s1434_s27 + $0x10] sm:$0xff]  ;;  %v912_v6 = vld [vmem:[%s1434_s27 + $0x8] sm:$0xff]  ;;  %v911_v7 = vld [vmem:[%s1434_s27] sm:$0xff]  ;;  %s648_s22 = scalar_lea.hbm %s1562_s3, %s919_s28  ;;  %s635_s15 = scalar_lea.sflag [#allocation4], %s1420_s1 }
  0x33   : > { %v895_v8 = vld [vmem:[%s1426_s25] sm:$0xff]  ;;  %v896_v12 = vld [vmem:[%s1426_s25 + $0x8] sm:$0xff]  ;;  %v897_v16 = vld [vmem:[%s1426_s25 + $0x10] sm:$0xff]  ;;  %s651_s4 = sshll.u32 %s648_s22, 4  ;;  %s1226_s29 = scalar_lea.hbm %s1562_s3, 384  ;;  %s652_s4 = int_to_ptr.hbm [resolvable:$true] %s651_s4 }
  0x34   : > { %v899_v9 = vld [vmem:[%s1426_s25 + $0x20] sm:$0xff]  ;;  %v900_v13 = vld [vmem:[%s1426_s25 + $0x28] sm:$0xff]  ;;  %v901_v17 = vld [vmem:[%s1426_s25 + $0x30] sm:$0xff]  ;;  %s1220_s5 = sshra.s32 %s652_s4, 4  ;;  %s1221_s5 = int_to_ptr.hbm [resolvable:$true] %s1220_s5 }
  0x35   : > { %482 = vmatpush.bf16.msra.mxu0 %v917_v1  ;;  %1018 = vmatpush.bf16.msra.mxu1 %v917_v1  ;;  %v903_v10 = vld [vmem:[%s1426_s25 + $0x40] sm:$0xff]  ;;  %v904_v14 = vld [vmem:[%s1426_s25 + $0x48] sm:$0xff]  ;;  %v905_v18 = vld [vmem:[%s1426_s25 + $0x50] sm:$0xff]  ;;  %s1222_s7 = scalar_lea.hbm %s1221_s5, 128  ;;  %p1227_p6 = scmp.lt.s32.totalorder %s1221_s5, %s1562_s3 }
  0x36   : > { %1019 = vmatpush.bf16.msra.mxu2 %v917_v1  ;;  %1020 = vmatpush.bf16.msra.mxu3 %v917_v1  ;;  %v907_v11 = vld [vmem:[%s1426_s25 + $0x60] sm:$0xff]  ;;  %v908_v15 = vld [vmem:[%s1426_s25 + $0x68] sm:$0xff]  ;;  %v909_v19 = vld [vmem:[%s1426_s25 + $0x70] sm:$0xff]  ;;  %p1223_p3 = scmp.ne.s32.totalorder %s1221_s5, %s1222_s7  ;;  %p1228_p7 = scmp.lt.s32.totalorder %s1226_s29, %s1222_s7 }
  0x37   : > { %v898_v20 = vld [vmem:[%s1426_s25 + $0x18] sm:$0xff]  ;;  %v1467_v26 = vld [vmem:[%s250_s18] ss:$0 sm:$0xff] }
  0x38   : > { %v902_v21 = vld [vmem:[%s1426_s25 + $0x38] sm:$0xff]  ;;  %p1224_p4 = pnand %p1223_p3, %p1369_p9  ;;  %p1229_p8 = por %p1228_p7, %p1227_p6 }
  0x39   : > { %483 = vmatpush.bf16.msra.mxu0 %v916_v2  ;;  %1021 = vmatpush.bf16.msra.mxu1 %v916_v2  ;;  %v906_v22 = vld [vmem:[%s1426_s25 + $0x58] sm:$0xff] }
  0x3a   : > { %1022 = vmatpush.bf16.msra.mxu2 %v916_v2  ;;  %1023 = vmatpush.bf16.msra.mxu3 %v916_v2  ;;  %v910_v23 = vld [vmem:[%s1426_s25 + $0x78] sm:$0xff]  ;;  %p1225_p5 = pneg %p1224_p4 }
  0x3c   : > { %p1230_p10 = pnand %p1229_p8, %p1225_p5 }
  0x3d   : > { %484 = vmatpush.bf16.msra.mxu0 %v915_v3  ;;  %1024 = vmatpush.bf16.msra.mxu1 %v915_v3 }
  0x3e   : > { %1025 = vmatpush.bf16.msra.mxu2 %v915_v3  ;;  %1026 = vmatpush.bf16.msra.mxu3 %v915_v3 }
  0x41   : > { %485 = vmatpush.bf16.msra.mxu0 %v914_v4  ;;  %1027 = vmatpush.bf16.msra.mxu1 %v914_v4 }
  0x42   : > { %1028 = vmatpush.bf16.msra.mxu2 %v914_v4  ;;  %1029 = vmatpush.bf16.msra.mxu3 %v914_v4 }
  0x45   : > { %486 = vmatpush.bf16.msra.mxu0 %v913_v5  ;;  %1030 = vmatpush.bf16.msra.mxu1 %v913_v5 }
  0x46   : > { %1031 = vmatpush.bf16.msra.mxu2 %v913_v5  ;;  %1032 = vmatpush.bf16.msra.mxu3 %v913_v5 }
  0x49   : > { %487 = vmatpush.bf16.msra.mxu0 %v912_v6  ;;  %1033 = vmatpush.bf16.msra.mxu1 %v912_v6 }
  0x4a   : > { %1034 = vmatpush.bf16.msra.mxu2 %v912_v6  ;;  %1035 = vmatpush.bf16.msra.mxu3 %v912_v6 }
  0x4d   : > { %488 = vmatpush.bf16.msra.mxu0 %v911_v7  ;;  %1036 = vmatpush.bf16.msra.mxu1 %v911_v7 }
  0x4e   : > { %1037 = vmatpush.bf16.msra.mxu2 %v911_v7  ;;  %1038 = vmatpush.bf16.msra.mxu3 %v911_v7 }
  0x50   : > { %489 = vmatmul.bf16.vlgmr.msra.gmra.mxu0 %v895_v8  ;;  %509 = vmatmul.bf16.vlgmr.msra.gmra.mxu1 %v899_v9 }
  0x51   : > { %529 = vmatmul.bf16.vlgmr.msra.gmra.mxu2 %v903_v10  ;;  %549 = vmatmul.bf16.vlgmr.msra.gmra.mxu3 %v907_v11 }
  0x60   : > { %494 = vmatmul.bf16.gmra.mxu0 %v896_v12  ;;  %514 = vmatmul.bf16.gmra.mxu1 %v900_v13 }
  0x61   : > { %534 = vmatmul.bf16.gmra.mxu2 %v904_v14  ;;  %554 = vmatmul.bf16.gmra.mxu3 %v908_v15 }
  0x70   : > { %499 = vmatmul.bf16.gmra.mxu0 %v897_v16  ;;  %519 = vmatmul.bf16.gmra.mxu1 %v901_v17 }
  0x71   : > { %539 = vmatmul.bf16.gmra.mxu2 %v905_v18  ;;  %559 = vmatmul.bf16.gmra.mxu3 %v909_v19 }
  0x80   : > { %504 = vmatmul.bf16.gmra.mxu0 %v898_v20  ;;  %524 = vmatmul.bf16.gmra.mxu1 %v902_v21 }
  0x81   : > { %544 = vmatmul.bf16.gmra.mxu2 %v906_v22  ;;  %564 = vmatmul.bf16.gmra.mxu3 %v910_v23 }
  0xcd   : > { %v490_v24 = vpop.f32.mrf.mxu0  ;;  %v510_v25 = vpop.f32.mrf.mxu1 }
  0xce   : > { %v491_v31 = vadd.f32 %v1467_v26, %v490_v24  ;;  %v511_v32 = vadd.f32 %v1467_v26, %v510_v25 }
  0xd4   : > { %v530_v27 = vpop.f32.mrf.mxu2  ;;  %v550_v28 = vpop.f32.mrf.mxu3 }
  0xd5   : > { %v492_v29 = vpop.f32.mrf.mxu0  ;;  %v512_v30 = vpop.f32.mrf.mxu1  ;;  %v531_v39 = vadd.f32 %v1467_v26, %v530_v27  ;;  %v551_v40 = vadd.f32 %v1467_v26, %v550_v28 }
  0xd6   : > { %v493_v33 = vadd.f32 %v1467_v26, %v492_v29  ;;  %v513_v34 = vadd.f32 %v1467_v26, %v512_v30 }
  0xd8   : > { %v923_v35 = vpack.c.bf16 %v493_v33, %v491_v31  ;;  %v943_v36 = vpack.c.bf16 %v513_v34, %v511_v32 }
  0xda   : > { %924 = vst [vmem:[%s1475_s23] sm:$0xff] %v923_v35  }
  0xdb   : > { %1003 = vst [vmem:[%s1475_s23 + $0x20] sm:$0xff] %v943_v36  }
  0xdc   : > { %v532_v37 = vpop.f32.mrf.mxu2  ;;  %v552_v38 = vpop.f32.mrf.mxu3 }
  0xdd   : > { %v533_v41 = vadd.f32 %v1467_v26, %v532_v37  ;;  %v553_v42 = vadd.f32 %v1467_v26, %v552_v38  ;;  %v495_v43 = vpop.f32.mrf.mxu0  ;;  %v515_v44 = vpop.f32.mrf.mxu1 }
  0xde   : > { %v496_v51 = vadd.f32 %v1467_v26, %v495_v43  ;;  %v516_v52 = vadd.f32 %v1467_v26, %v515_v44 }
  0xdf   : > { %v963_v45 = vpack.c.bf16 %v533_v41, %v531_v39  ;;  %v983_v46 = vpack.c.bf16 %v553_v42, %v551_v40 }
  0xe1   : > { %1007 = vst [vmem:[%s1475_s23 + $0x40] sm:$0xff] %v963_v45  }
  0xe2   : > { %1011 = vst [vmem:[%s1475_s23 + $0x60] sm:$0xff] %v983_v46  }
  0xe4   : > { %v535_v47 = vpop.f32.mrf.mxu2  ;;  %v555_v48 = vpop.f32.mrf.mxu3 }
  0xe5   : > { %v497_v49 = vpop.f32.mrf.mxu0  ;;  %v517_v50 = vpop.f32.mrf.mxu1  ;;  %v536_v59 = vadd.f32 %v1467_v26, %v535_v47  ;;  %v556_v60 = vadd.f32 %v1467_v26, %v555_v48 }
  0xe6   : > { %v498_v53 = vadd.f32 %v1467_v26, %v497_v49  ;;  %v518_v54 = vadd.f32 %v1467_v26, %v517_v50 }
  0xe8   : > { %v928_v55 = vpack.c.bf16 %v498_v53, %v496_v51  ;;  %v948_v56 = vpack.c.bf16 %v518_v54, %v516_v52 }
  0xea   : > { %1000 = vst [vmem:[%s1475_s23 + $0x8] sm:$0xff] %v928_v55  }
  0xeb   : > { %1004 = vst [vmem:[%s1475_s23 + $0x28] sm:$0xff] %v948_v56  }
  0xec   : > { %v537_v57 = vpop.f32.mrf.mxu2  ;;  %v557_v58 = vpop.f32.mrf.mxu3 }
  0xed   : > { %v538_v61 = vadd.f32 %v1467_v26, %v537_v57  ;;  %v558_v62 = vadd.f32 %v1467_v26, %v557_v58  ;;  %v500_v63 = vpop.f32.mrf.mxu0  ;;  %v520_v0 = vpop.f32.mrf.mxu1 }
  0xee   : > { %v501_v7 = vadd.f32 %v1467_v26, %v500_v63  ;;  %v521_v8 = vadd.f32 %v1467_v26, %v520_v0 }
  0xef   : > { %v968_v1 = vpack.c.bf16 %v538_v61, %v536_v59  ;;  %v988_v2 = vpack.c.bf16 %v558_v62, %v556_v60 }
  0xf1   : > { %1008 = vst [vmem:[%s1475_s23 + $0x48] sm:$0xff] %v968_v1  }
  0xf2   : > { %1012 = vst [vmem:[%s1475_s23 + $0x68] sm:$0xff] %v988_v2  }
  0xf4   : > { %v540_v3 = vpop.f32.mrf.mxu2  ;;  %v560_v4 = vpop.f32.mrf.mxu3 }
  0xf5   : > { %v502_v5 = vpop.f32.mrf.mxu0  ;;  %v522_v6 = vpop.f32.mrf.mxu1  ;;  %v541_v15 = vadd.f32 %v1467_v26, %v540_v3  ;;  %v561_v16 = vadd.f32 %v1467_v26, %v560_v4 }
  0xf6   : > { %v503_v9 = vadd.f32 %v1467_v26, %v502_v5  ;;  %v523_v10 = vadd.f32 %v1467_v26, %v522_v6 }
  0xf8   : > { %v933_v11 = vpack.c.bf16 %v503_v9, %v501_v7  ;;  %v953_v12 = vpack.c.bf16 %v523_v10, %v521_v8 }
  0xfa   : > { %1001 = vst [vmem:[%s1475_s23 + $0x10] sm:$0xff] %v933_v11  }
  0xfb   : > { %1005 = vst [vmem:[%s1475_s23 + $0x30] sm:$0xff] %v953_v12  }
  0xfc   : > { %v542_v13 = vpop.f32.mrf.mxu2  ;;  %v562_v14 = vpop.f32.mrf.mxu3 }
  0xfd   : > { %v543_v17 = vadd.f32 %v1467_v26, %v542_v13  ;;  %v563_v18 = vadd.f32 %v1467_v26, %v562_v14  ;;  %v505_v19 = vpop.f32.mrf.mxu0  ;;  %v525_v20 = vpop.f32.mrf.mxu1 }
  0xfe   : > { %v506_v28 = vadd.f32 %v1467_v26, %v505_v19  ;;  %v526_v29 = vadd.f32 %v1467_v26, %v525_v20 }
  0xff   : > { %v973_v21 = vpack.c.bf16 %v543_v17, %v541_v15  ;;  %v993_v22 = vpack.c.bf16 %v563_v18, %v561_v16 }
 0x101   : > { %1009 = vst [vmem:[%s1475_s23 + $0x50] sm:$0xff] %v973_v21  }
 0x102   : > { %1013 = vst [vmem:[%s1475_s23 + $0x70] sm:$0xff] %v993_v22  }
 0x104   : > { %v545_v23 = vpop.f32.mrf.mxu2  ;;  %v565_v24 = vpop.f32.mrf.mxu3 }
 0x105   : > { %v507_v25 = vpop.f32.mrf.mxu0  ;;  %v527_v27 = vpop.f32.mrf.mxu1  ;;  %v546_v36 = vadd.f32 %v1467_v26, %v545_v23  ;;  %v566_v37 = vadd.f32 %v1467_v26, %v565_v24 }
 0x106   : > { %v508_v30 = vadd.f32 %v1467_v26, %v507_v25  ;;  %v528_v31 = vadd.f32 %v1467_v26, %v527_v27 }
 0x108   : > { %v938_v32 = vpack.c.bf16 %v508_v30, %v506_v28  ;;  %v958_v33 = vpack.c.bf16 %v528_v31, %v526_v29 }
 0x10a   : > { %1002 = vst [vmem:[%s1475_s23 + $0x18] sm:$0xff] %v938_v32  }
 0x10b   : > { %1006 = vst [vmem:[%s1475_s23 + $0x38] sm:$0xff] %v958_v33  }
 0x10c   : > { %v547_v34 = vpop.f32.mrf.mxu2  ;;  %v567_v35 = vpop.f32.mrf.mxu3 }
 0x10d   : > { %v548_v38 = vadd.f32 %v1467_v26, %v547_v34  ;;  %v568_v39 = vadd.f32 %v1467_v26, %v567_v35 }
 0x10f   : > { %v978_v40 = vpack.c.bf16 %v548_v38, %v546_v36  ;;  %v998_v41 = vpack.c.bf16 %v568_v39, %v566_v37 }
 0x111   : > { %1010 = vst [vmem:[%s1475_s23 + $0x58] sm:$0xff] %v978_v40  }
 0x112   : > { %1014 = vst [vmem:[%s1475_s23 + $0x78] sm:$0xff] %v998_v41  }
 0x113   : > { %1233 = shalt.err (!%p1230_p10)
}
 0x114   : > { %s1296_s1 = smov 64   ;;  %s1297_s20 = smov 4  }
 0x115   : > { %1045 = dma.vmem_to_hbm [thread:$0]  (%p1369_p9), %s650_s30, 2048, %s652_s4, %s635_s15, %s1296_s1, %s1296_s1, %s1297_s20  }
 0x116 PF: > { %s1579_s19 = sld [smem:[#allocation12_spill]]  ;;  %p1062_p12 = scmp.ge.s32.totalorder %s1292_s17, 2 }
 0x118   : > { %p1058_p13 = pnand %p1062_p12, %p1376_p11 }
 0x11a   : > { %p1059_p0 = pneg %p1058_p13 }
 0x11c   : > { %s666_s12 = sand.u32 1, %s1579_s19  }
 0x11d   : > { %s667_s14 = scalar_lea.sflag [#allocation4], %s666_s12 }
 0x11e   : > { %1267 = dma.done.wait (%p1059_p0), %s667_s14, 2048  }
 0x11f   : > { %1269 = vsyncadd (%p1059_p0), %s667_s14, 4294965248  ;;  %s22_s17 = sadd.s32 1, %s1292_s17   ;;  %s1581_s26 = sld [smem:[#allocation13_spill]] }
 0x120   : > { %p19_p1 = scmp.ge.s32.totalorder %s22_s17, 5   ;;  %s1582_s14 = sld [smem:[#allocation15_spill]] }
 0x121   : > { %s1583_s24 = sld [smem:[#allocation14_spill]]  ;;  %s1584_s12 = smov %s1276_s13 }
 0x122   : > { %s1586_s15 = smov %s1288_s16 }
 0x123   :  { %21 = sbr.rel (!%p19_p1) target bundleno = 10 (0xa), region = 101 }
 0x125   : > { %s1585_s13 = smov %s1581_s26 }
 0x127   : > { %s1587_s16 = smov %s1583_s24 }
 0x128   :  { %673 = vsyncpa [#allocation3], 1 }
 0x129   :  { %675 = vsyncpa [#allocation3 + $0x1], 1 }
 0x12a   :  { %676 = vsyncpa [#allocation6], 1 }
 0x12b   :  { %678 = vsyncpa [#allocation6 + $0x1], 1 }
 0x12c   :  { %679 = vsyncpa [#allocation4], 1 }
 0x12d   :  { %681 = vsyncpa [#allocation4 + $0x1], 1 }

</bundles_post_ra>
